<compile_context>
chip_gen: v7x
topology: tpu7x:2x2x1
jax: 0.10.0
libtpu: 0.0.40
codegen_flags: <defaults>
</compile_context>

<pallas_src>
import jax
import jax.numpy as jnp
from jax.experimental import pallas as pl
from jax.experimental.pallas import tpu as pltpu


def _leaky_relu(x, negative_slope=0.01):
    # Matches torch.nn.LeakyReLU default; max(x, a*x) == where(x>0, x, a*x) for a in (0,1).
    return jnp.maximum(x, negative_slope * x)


def _fused_policy_kernel(obs_ref, w1_ref, b1_ref, w2_ref, b2_ref, w3_ref, b3_ref,
                         out_ref):
    x = obs_ref[...]
    h = jnp.dot(x, w1_ref[...], preferred_element_type=jnp.float32) + b1_ref[...]
    h = _leaky_relu(h)
    h = jnp.dot(h, w2_ref[...], preferred_element_type=jnp.float32) + b2_ref[...]
    h = _leaky_relu(h)
    y = jnp.dot(h, w3_ref[...], preferred_element_type=jnp.float32) + b3_ref[...]
    out_ref[...] = y.astype(out_ref.dtype)


def fuse_params(p):
    """Pack the two nets into one fused network.  Call ONCE (hoisted out of the
    per-step forward path).

    w1: [in, 2H]   (columns = [mean | std])
    w2: [2H, 2H]   block-diagonal
    w3: [2H, 2A]   block-diagonal
    biases concatenated along the feature axis.
    """
    H = p["w1m"].shape[1]
    A = p["w3m"].shape[1]
    dt = p["w1m"].dtype

    w1 = jnp.concatenate([p["w1m"], p["w1s"]], axis=1)
    b1 = jnp.concatenate([p["b1m"], p["b1s"]], axis=1)

    zH = jnp.zeros((H, H), dt)
    w2 = jnp.block([[p["w2m"], zH], [zH, p["w2s"]]])
    b2 = jnp.concatenate([p["b2m"], p["b2s"]], axis=1)

    zA = jnp.zeros((H, A), dt)
    w3 = jnp.block([[p["w3m"], zA], [zA, p["w3s"]]])
    b3 = jnp.concatenate([p["b3m"], p["b3s"]], axis=1)
    return dict(w1=w1, b1=b1, w2=w2, b2=b2, w3=w3, b3=b3)


def continuous_policy_forward(obs, fused, *, block_b=4096):
    """obs: [B, input_size]; fused: dict from fuse_params() (pre-transposed [in, out])."""
    B, in_size = obs.shape
    w1, b1 = fused["w1"], fused["b1"]
    w2, b2 = fused["w2"], fused["b2"]
    w3, b3 = fused["w3"], fused["b3"]
    H2 = w1.shape[1]          # 2 * hidden_size
    A2 = w3.shape[1]          # 2 * nb_actions
    A = A2 // 2

    # ---- batch tiling -------------------------------------------------------
    rb = ((B + 7) // 8) * 8                      # sublane-aligned batch
    tb = min(block_b, rb)
    if rb >= 2048:
        # Ensure >= 2 grid steps for large batches so the "parallel" axis can
        # shard across both TensorCores on v7x and DMA overlaps compute.
        half = ((-(-rb // 2)) + 7) // 8 * 8
        tb = min(tb, half)
    pad_b = -(-rb // tb) * tb
    obs_p = obs if pad_b == B else jnp.pad(obs, ((0, pad_b - B), (0, 0)))

    grid = (pad_b // tb,)
    batch_map = lambda i: (i, 0)
    const_map = lambda i: (0, 0)

    # ---- generation-aware VMEM budget --------------------------------------
    param_bytes = sum(int(a.size) * a.dtype.itemsize for a in (w1, b1, w2, b2, w3, b3))
    io_bytes = (tb * in_size + tb * A2) * 4            # one obs tile + one out tile
    need = 2 * param_bytes + 2 * io_bytes + (4 << 20)  # 2x: conservative double-buffer charge
    try:
        cap = int(pltpu.get_tpu_info().vmem_capacity_bytes)
    except Exception:  # pragma: no cover - conservative fallback (safe on v7x's 64 MiB)
        cap = 64 * 1024 * 1024
    vmem_limit = int(min(max(need, 16 << 20), (3 * cap) // 4))

    out = pl.pallas_call(
        _fused_policy_kernel,
        out_shape=jax.ShapeDtypeStruct((pad_b, A2), jnp.float32),
        grid=grid,
        in_specs=[
            pl.BlockSpec((tb, in_size), batch_map),   # obs tile (pipelined)
            pl.BlockSpec((in_size, H2), const_map),   # fused W1 (VMEM resident)
            pl.BlockSpec((1, H2), const_map),         # fused b1
            pl.BlockSpec((H2, H2), const_map),        # block-diag W2
            pl.BlockSpec((1, H2), const_map),         # fused b2
            pl.BlockSpec((H2, A2), const_map),        # block-diag W3
            pl.BlockSpec((1, A2), const_map),         # fused b3
        ],
        out_specs=pl.BlockSpec((tb, A2), batch_map),  # single [mean|std] slab
        compiler_params=pltpu.CompilerParams(
            dimension_semantics=("parallel",),
            vmem_limit_bytes=vmem_limit,
        ),
    )(obs_p, w1, b1, w2, b2, w3, b3)

    mean = out[:B, :A]
    std = out[:B, A:]
    return mean, std


def init_params(key, input_size, hidden_size, nb_actions):
    """Deterministic init mimicking PyTorch Linear default (uniform +/- 1/sqrt(fan_in)).
    Weights are stored pre-transposed as [in, out]."""
    ks = jax.random.split(key, 12)

    def linear(kw, kb, fan_in, fan_out):
        bound = 1.0 / jnp.sqrt(fan_in)
        w = jax.random.uniform(kw, (fan_in, fan_out), jnp.float32, -bound, bound)
        b = jax.random.uniform(kb, (1, fan_out), jnp.float32, -bound, bound)
        return w, b

    w1m, b1m = linear(ks[0], ks[1], input_size, hidden_size)
    w2m, b2m = linear(ks[2], ks[3], hidden_size, hidden_size)
    w3m, b3m = linear(ks[4], ks[5], hidden_size, nb_actions)
    w1s, b1s = linear(ks[6], ks[7], input_size, hidden_size)
    w2s, b2s = linear(ks[8], ks[9], hidden_size, hidden_size)
    w3s, b3s = linear(ks[10], ks[11], hidden_size, nb_actions)
    return dict(
        w1m=w1m, b1m=b1m, w2m=w2m, b2m=b2m, w3m=w3m, b3m=b3m,
        w1s=w1s, b1s=b1s, w2s=w2s, b2s=b2s, w3s=w3s, b3s=b3s,
    )


def reference_forward(obs, p):
    def net(x, w1, b1, w2, b2, w3, b3):
        h = _leaky_relu(x @ w1 + b1)
        h = _leaky_relu(h @ w2 + b2)
        return h @ w3 + b3
    return (
        net(obs, p["w1m"], p["b1m"], p["w2m"], p["b2m"], p["w3m"], p["b3m"]),
        net(obs, p["w1s"], p["b1s"], p["w2s"], p["b2s"], p["w3s"], p["b3s"]),
    )


if __name__ == "__main__":
    key = jax.random.PRNGKey(0)
    k_obs, k_param = jax.random.split(key)

    batch = 2
    input_size = 16
    hidden_size = 32
    nb_actions = 8

    obs = jax.random.normal(k_obs, (batch, input_size), jnp.float32)
    params = init_params(k_param, input_size, hidden_size, nb_actions)
    fused = fuse_params(params)          # hoisted: done once, reused every forward

    fwd = jax.jit(continuous_policy_forward)
    mean, std = fwd(obs, fused)
    jax.block_until_ready((mean, std))

    ref_mean, ref_std = reference_forward(obs, params)
    assert mean.shape == (batch, nb_actions) and std.shape == (batch, nb_actions)
    assert jnp.allclose(mean, ref_mean, atol=1e-5, rtol=1e-5)
    assert jnp.allclose(std, ref_std, atol=1e-5, rtol=1e-5)

    print("KERNEL_OK")
</pallas_src>

<mosaic_0001>
module attributes {stable_mosaic.version = 11 : i64} {
  func.func @_fused_policy_kernel(%arg0: i32, %arg1: memref<8x16xf32, #tpu.memory_space<vmem>>, %arg2: memref<16x64xf32, #tpu.memory_space<vmem>>, %arg3: memref<1x64xf32, #tpu.memory_space<vmem>>, %arg4: memref<64x64xf32, #tpu.memory_space<vmem>>, %arg5: memref<1x64xf32, #tpu.memory_space<vmem>>, %arg6: memref<64x16xf32, #tpu.memory_space<vmem>>, %arg7: memref<1x16xf32, #tpu.memory_space<vmem>>, %arg8: memref<8x16xf32, #tpu.memory_space<vmem>>) attributes {dimension_semantics = [#tpu.dimension_semantics<parallel>], iteration_bounds = array<i64: 1>, scalar_prefetch = 0 : i64, scratch_operands = 0 : i64, tpu.core_type = #tpu.core_type<tc>, window_params = [{transform_indices = @transform_0, window_bounds = array<i64: 8, 16>}, {pipeline_mode = #tpu.pipeline_mode<synchronous>, transform_indices = @transform_1, window_bounds = array<i64: 16, 64>}, {pipeline_mode = #tpu.pipeline_mode<synchronous>, transform_indices = @transform_2, window_bounds = array<i64: 1, 64>}, {pipeline_mode = #tpu.pipeline_mode<synchronous>, transform_indices = @transform_3, window_bounds = array<i64: 64, 64>}, {pipeline_mode = #tpu.pipeline_mode<synchronous>, transform_indices = @transform_4, window_bounds = array<i64: 1, 64>}, {pipeline_mode = #tpu.pipeline_mode<synchronous>, transform_indices = @transform_5, window_bounds = array<i64: 64, 16>}, {pipeline_mode = #tpu.pipeline_mode<synchronous>, transform_indices = @transform_6, window_bounds = array<i64: 1, 16>}, {transform_indices = @transform_7, window_bounds = array<i64: 8, 16>}]} {
    %c0 = arith.constant 0 : index
    %c0_0 = arith.constant 0 : index
    %0 = vector.load %arg1[%c0, %c0_0] : memref<8x16xf32, #tpu.memory_space<vmem>>, vector<8x16xf32>
    %c0_1 = arith.constant 0 : index
    %c0_2 = arith.constant 0 : index
    %1 = vector.load %arg2[%c0_1, %c0_2] : memref<16x64xf32, #tpu.memory_space<vmem>>, vector<16x64xf32>
    %cst = arith.constant dense<0.000000e+00> : vector<8x64xf32>
    %2 = tpu.matmul %0, %1, %cst {dimension_numbers = #tpu.dot_dimension_numbers<[1], [0], [0], [1], [0, 0, 1, 1], [], []>} : vector<8x16xf32>, vector<16x64xf32>, vector<8x64xf32> -> vector<8x64xf32>
    %c0_3 = arith.constant 0 : index
    %c0_4 = arith.constant 0 : index
    %3 = vector.load %arg3[%c0_3, %c0_4] : memref<1x64xf32, #tpu.memory_space<vmem>>, vector<1x64xf32>
    %4 = vector.broadcast %3 : vector<1x64xf32> to vector<8x64xf32>
    %5 = arith.addf %2, %4 : vector<8x64xf32>
    %cst_5 = arith.constant 0.00999999977 : f32
    %6 = vector.broadcast %cst_5 : f32 to vector<8x64xf32>
    %7 = arith.mulf %6, %5 : vector<8x64xf32>
    %8 = arith.maximumf %5, %7 : vector<8x64xf32>
    %c0_6 = arith.constant 0 : index
    %c0_7 = arith.constant 0 : index
    %9 = vector.load %arg4[%c0_6, %c0_7] : memref<64x64xf32, #tpu.memory_space<vmem>>, vector<64x64xf32>
    %cst_8 = arith.constant dense<0.000000e+00> : vector<8x64xf32>
    %10 = tpu.matmul %8, %9, %cst_8 {dimension_numbers = #tpu.dot_dimension_numbers<[1], [0], [0], [1], [0, 0, 1, 1], [], []>} : vector<8x64xf32>, vector<64x64xf32>, vector<8x64xf32> -> vector<8x64xf32>
    %c0_9 = arith.constant 0 : index
    %c0_10 = arith.constant 0 : index
    %11 = vector.load %arg5[%c0_9, %c0_10] : memref<1x64xf32, #tpu.memory_space<vmem>>, vector<1x64xf32>
    %12 = vector.broadcast %11 : vector<1x64xf32> to vector<8x64xf32>
    %13 = arith.addf %10, %12 : vector<8x64xf32>
    %cst_11 = arith.constant 0.00999999977 : f32
    %14 = vector.broadcast %cst_11 : f32 to vector<8x64xf32>
    %15 = arith.mulf %14, %13 : vector<8x64xf32>
    %16 = arith.maximumf %13, %15 : vector<8x64xf32>
    %c0_12 = arith.constant 0 : index
    %c0_13 = arith.constant 0 : index
    %17 = vector.load %arg6[%c0_12, %c0_13] : memref<64x16xf32, #tpu.memory_space<vmem>>, vector<64x16xf32>
    %cst_14 = arith.constant dense<0.000000e+00> : vector<8x16xf32>
    %18 = tpu.matmul %16, %17, %cst_14 {dimension_numbers = #tpu.dot_dimension_numbers<[1], [0], [0], [1], [0, 0, 1, 1], [], []>} : vector<8x64xf32>, vector<64x16xf32>, vector<8x16xf32> -> vector<8x16xf32>
    %c0_15 = arith.constant 0 : index
    %c0_16 = arith.constant 0 : index
    %19 = vector.load %arg7[%c0_15, %c0_16] : memref<1x16xf32, #tpu.memory_space<vmem>>, vector<1x16xf32>
    %20 = vector.broadcast %19 : vector<1x16xf32> to vector<8x16xf32>
    %21 = arith.addf %18, %20 : vector<8x16xf32>
    %c0_17 = arith.constant 0 : index
    %c0_18 = arith.constant 0 : index
    %22 = vector.load %arg8[%c0_17, %c0_18] : memref<8x16xf32, #tpu.memory_space<vmem>>, vector<8x16xf32>
    tpu.vector_store %arg8[%c0_17, %c0_18], %21 {strides = array<i32>} : memref<8x16xf32, #tpu.memory_space<vmem>>, vector<8x16xf32>,
    return
  }
  func.func @transform_0(%arg0: i32) -> (i32, i32) {
    %c0_i32 = arith.constant 0 : i32
    %c0_i32_0 = arith.constant 0 : i32
    return %arg0, %c0_i32 : i32, i32
  }
  func.func @transform_1(%arg0: i32) -> (i32, i32) {
    %c0_i32 = arith.constant 0 : i32
    %c0_i32_0 = arith.constant 0 : i32
    %c0_i32_1 = arith.constant 0 : i32
    return %c0_i32, %c0_i32_0 : i32, i32
  }
  func.func @transform_2(%arg0: i32) -> (i32, i32) {
    %c0_i32 = arith.constant 0 : i32
    %c0_i32_0 = arith.constant 0 : i32
    %c0_i32_1 = arith.constant 0 : i32
    return %c0_i32, %c0_i32_0 : i32, i32
  }
  func.func @transform_3(%arg0: i32) -> (i32, i32) {
    %c0_i32 = arith.constant 0 : i32
    %c0_i32_0 = arith.constant 0 : i32
    %c0_i32_1 = arith.constant 0 : i32
    return %c0_i32, %c0_i32_0 : i32, i32
  }
  func.func @transform_4(%arg0: i32) -> (i32, i32) {
    %c0_i32 = arith.constant 0 : i32
    %c0_i32_0 = arith.constant 0 : i32
    %c0_i32_1 = arith.constant 0 : i32
    return %c0_i32, %c0_i32_0 : i32, i32
  }
  func.func @transform_5(%arg0: i32) -> (i32, i32) {
    %c0_i32 = arith.constant 0 : i32
    %c0_i32_0 = arith.constant 0 : i32
    %c0_i32_1 = arith.constant 0 : i32
    return %c0_i32, %c0_i32_0 : i32, i32
  }
  func.func @transform_6(%arg0: i32) -> (i32, i32) {
    %c0_i32 = arith.constant 0 : i32
    %c0_i32_0 = arith.constant 0 : i32
    %c0_i32_1 = arith.constant 0 : i32
    return %c0_i32, %c0_i32_0 : i32, i32
  }
  func.func @transform_7(%arg0: i32) -> (i32, i32) {
    %c0_i32 = arith.constant 0 : i32
    %c0_i32_0 = arith.constant 0 : i32
    return %arg0, %c0_i32 : i32, i32
  }
}

</mosaic_0001>

<bundles_post_ra>
// kernel: continuous_policy_forward.1
= control target key start
LH: loop header
LB: loop body
LE: loop exit
PB: predicated region body
PF: predicated region fallthrough
CT: control target
= control target key end

     0   :  { %v398_v0 = vmov 0.0|0.0   ;;  %vm399_vm0 = vmmov 0   ;;  %v400_v3 = vmov 0.0   ;;  %vm36_vm1 = vcmask 130048   ;;  %s517_s1 = inlined_call_operand.vmem [shape: f32[16,64], index: 1, kind: input, shape index: {}]   ;;  %s518_s3 = inlined_call_operand.vmem [shape: f32[64,64], index: 3, kind: input, shape index: {}]   ;;  %s519_s0 = inlined_call_operand.vmem [shape: f32[8,16], index: 0, kind: input, shape index: {}]   ;;  %s520_s5 = inlined_call_operand.vmem [shape: f32[64,16], index: 5, kind: input, shape index: {}]   ;;  %s521_s2 = inlined_call_operand.vmem [shape: f32[1,64], index: 2, kind: input, shape index: {}]   ;;  %s522_s4 = inlined_call_operand.vmem [shape: f32[1,64], index: 4, kind: input, shape index: {}]   ;;  %s523_s6 = inlined_call_operand.vmem [shape: f32[1,16], index: 6, kind: input, shape index: {}]   ;;  %s524_s7 = inlined_call_operand.vmem [shape: f32[8,16], index: 7, kind: output, shape index: {}]  }
   0x1   :  { %368 = vmatprep.subr.bf16.mxu0 %v398_v0  ;;  %v27_v1 = vld [vmem:[%s517_s1] sm:$0xff]  ;;  %v28_v2 = vld [vmem:[%s517_s1 + $0x8] sm:$0xff]  ;;  %327 = vmatprep.mubr.msk.f32.mxu0 %vm399_vm0, %v400_v3  ;;  %v114_v7 = vld [vmem:[%s518_s3 + $0x10] sm:$0xff]  ;;  %vm127_vm2 = vcmask 523264  }
   0x2   :  { %v369_v4 = vpack.c.bf16 %v28_v2, %v27_v1  ;;  %371 = vmatprep.subr.bf16.mxu1 %v398_v0  ;;  %v112_v5 = vld [vmem:[%s518_s3] sm:$0xff]  ;;  %v113_v6 = vld [vmem:[%s518_s3 + $0x8] sm:$0xff]  ;;  %346 = vmatprep.mubr.msk.f32.mxu1 %vm399_vm0, %v400_v3  ;;  %v115_v9 = vld [vmem:[%s518_s3 + $0x18] sm:$0xff] }
   0x3   :  { %v372_v8 = vpack.c.bf16 %v113_v6, %v112_v5  ;;  %v26_v10 = vld [vmem:[%s519_s0] sm:$0xff]  ;;  %v375_v11 = vpack.c.bf16 %v115_v9, %v114_v7  ;;  %v117_v13 = vld [vmem:[%s518_s3 + $0x28] sm:$0xff]  ;;  %v118_v15 = vld [vmem:[%s518_s3 + $0x30] sm:$0xff] }
   0x4   :  { %370 = vmatpush3.bf16.msra.mxu0 %v369_v4  ;;  %v116_v12 = vld [vmem:[%s518_s3 + $0x20] sm:$0xff]  ;;  %v119_v16 = vld [vmem:[%s518_s3 + $0x38] sm:$0xff]  ;;  %v204_v19 = vld [vmem:[%s520_s5 + $0x8] sm:$0xff] }
   0x5   :  { %373 = vmatpush3.bf16.msra.mxu1 %v372_v8  ;;  %383 = vmatprep.subr.bf16.mxu0 %v398_v0  ;;  %v378_v14 = vpack.c.bf16 %v117_v13, %v116_v12  ;;  %v381_v17 = vpack.c.bf16 %v119_v16, %v118_v15  ;;  %v203_v18 = vld [vmem:[%s520_s5] sm:$0xff]  ;;  %v205_v20 = vld [vmem:[%s520_s5 + $0x10] sm:$0xff]  ;;  %v206_v22 = vld [vmem:[%s520_s5 + $0x18] sm:$0xff] }
   0x6   :  { %374 = vmatprep.subr.bf16.mxu1 %v398_v0  ;;  %v384_v21 = vpack.c.bf16 %v204_v19, %v203_v18  ;;  %v387_v23 = vpack.c.bf16 %v206_v22, %v205_v20  ;;  %v296_v24 = vld [vmem:[%s521_s2] ss:$0 sm:$0xff]  ;;  %v208_v31 = vld [vmem:[%s520_s5 + $0x28] sm:$0xff]  ;;  %v209_v33 = vld [vmem:[%s520_s5 + $0x30] sm:$0xff] }
   0x7   :  { %328 = vmatmul.mubr.msk.f32.vlgmr.msra.gmra.mrb[0].mxu0 %vm36_vm1, %v26_v10  ;;  %v207_v30 = vld [vmem:[%s520_s5 + $0x20] sm:$0xff]  ;;  %v210_v34 = vld [vmem:[%s520_s5 + $0x38] sm:$0xff] }
   0x8   :  { %365 = vmatprep.mubr.msk.f32.mxu0 %vm399_vm0, %v400_v3  ;;  %385 = vmatpush3.bf16.msra.mxu0 %v384_v21  ;;  %v390_v32 = vpack.c.bf16 %v208_v31, %v207_v30  ;;  %v393_v35 = vpack.c.bf16 %v210_v34, %v209_v33  ;;  %v298_v36 = vld [vmem:[%s522_s4] ss:$0 sm:$0xff] }
   0x9   :  { %376 = vmatpush3.bf16.msra.mxu1 %v375_v11  ;;  %386 = vmatprep.subr.bf16.mxu0 %v398_v0  ;;  %v300_v42 = vld [vmem:[%s523_s6] ss:$0 sm:$0xff] }
   0xa   :  { %377 = vmatprep.subr.bf16.mxu1 %v398_v0 }
   0xc   :  { %388 = vmatpush3.bf16.msra.mxu0 %v387_v23 }
   0xd   :  { %379 = vmatpush3.bf16.msra.mxu1 %v378_v14  ;;  %389 = vmatprep.subr.bf16.mxu0 %v398_v0 }
   0xe   :  { %380 = vmatprep.subr.bf16.mxu1 %v398_v0 }
  0x10   :  { %391 = vmatpush3.bf16.msra.mxu0 %v390_v32 }
  0x11   :  { %382 = vmatpush3.bf16.msra.mxu1 %v381_v17  ;;  %392 = vmatprep.subr.bf16.mxu0 %v398_v0 }
  0x14   :  { %394 = vmatpush3.bf16.msra.mxu0 %v393_v35 }
  0xda   :  { %v106_v25 = vpop.f32.mrb[0].mxu0 }
  0xdb   :  { %v107_v26 = vadd.f32 %v296_v24, %v106_v25  ;;  %v329_v27 = vpop.f32.mrb[1].mxu0 }
  0xdd   :  { %v110_v28 = vmul.f32 0.01, %v107_v26 }
  0xdf   :  { %v111_v29 = vmax.f32 %v107_v26, %v110_v28 }
  0xe1   :  { %347 = vmatmul.mubr.msk.f32.vlgmr.msra.gmra.mrb[0].mxu1 %vm127_vm2, %v111_v29 }
 0x1b4   :  { %v197_v37 = vpop.f32.mrb[0].mxu1 }
 0x1b5   :  { %v198_v38 = vadd.f32 %v298_v36, %v197_v37  ;;  %v348_v39 = vpop.f32.mrb[1].mxu1 }
 0x1b7   :  { %v201_v40 = vmul.f32 0.01, %v198_v38 }
 0x1b9   :  { %v202_v41 = vmax.f32 %v198_v38, %v201_v40 }
 0x1bb   :  { %366 = vmatmul.mubr.msk.f32.vlgmr.msra.gmra.mrb[2].mxu0 %vm127_vm2, %v202_v41 }
 0x28e   :  { %v287_v43 = vpop.f32.mrb[2].mxu0 }
 0x28f   :  { %v288_v44 = vadd.f32 %v300_v42, %v287_v43  ;;  %v367_v45 = vpop.f32.mrb[3].mxu0 }
 0x291   :  { %291 = vst.msk [vmem:[%s524_s7] sm:$0xff] %vm36_vm1, %v288_v44 }

</bundles_post_ra>
